<compile_context>
chip_gen: v5e
topology: v5e:2x2
jax: 0.10.0
libtpu: 0.0.40
codegen_flags: <defaults>
</compile_context>

<pallas_src>
import functools
import math

import jax
import jax.numpy as jnp
from jax import lax
from jax.experimental import pallas as pl
from jax.experimental.pallas import tpu as pltpu


def _round_up(x, m):
    return ((x + m - 1) // m) * m


def _pick_tile(dim, pref, align):
    """Largest tile <= pref (multiple of `align`) that avoids padding when cheap."""
    pref = max(align, (pref // align) * align)
    padded = _round_up(dim, align)
    if padded <= pref:
        return padded                      # whole (aligned) dim fits in one tile
    cand = pref
    while cand >= max(align, pref // 2):   # prefer a divisor near the preferred size
        if padded % cand == 0:
            return cand
        cand -= align
    return pref                            # accept padding up to a multiple of pref


def _pad2(a, rows, cols):
    if a.shape == (rows, cols):
        return a
    return jnp.pad(a, ((0, rows - a.shape[0]), (0, cols - a.shape[1])))


# ---------------------------------------------------------------------------
# Kernel bodies
# ---------------------------------------------------------------------------
def _accumulate(partial, b_ref, o_ref, acc_ref):
    """Accumulate one k-step partial product; add bias exactly once per tile."""
    k = pl.program_id(2)
    k_last = pl.num_programs(2) - 1

    if acc_ref is None:
        # f32 output: accumulate directly into the k-resident output tile.
        @pl.when(k == 0)
        def _init():
            o_ref[...] = jnp.broadcast_to(
                b_ref[...].astype(o_ref.dtype), o_ref.shape)
        o_ref[...] += partial
    else:
        @pl.when(k == 0)
        def _init():
            acc_ref[...] = jnp.zeros_like(acc_ref)
        acc_ref[...] += partial

        @pl.when(k == k_last)
        def _finalize():
            o_ref[...] = (acc_ref[...]
                          + b_ref[...].astype(jnp.float32)).astype(o_ref.dtype)


def _bayes_linear_fused_kernel(x_ref, mu_ref, rho_ref, eps_ref, b_ref, o_ref,
                               *scratch, mxu_dtype):
    """Fused reparameterization + matmul (used when M fits in one tile pass)."""
    acc_ref = scratch[0] if scratch else None
    mu = mu_ref[...].astype(jnp.float32)
    rho = rho_ref[...].astype(jnp.float32)
    eps = eps_ref[...].astype(jnp.float32)
    sigma = jax.nn.softplus(rho) + 1e-5                     # f32, keeps 1e-5 floor
    w = (mu + eps * sigma).astype(mxu_dtype)                # (tn, tk)

    # Contract on K; RHS keeps (N, K) layout (no explicit transpose pass).
    partial = lax.dot_general(
        x_ref[...].astype(mxu_dtype), w,
        dimension_numbers=(((1,), (1,)), ((), ())),
        preferred_element_type=jnp.float32)
    _accumulate(partial, b_ref, o_ref, acc_ref)


def _bayes_linear_w_kernel(x_ref, w_ref, b_ref, o_ref, *scratch, mxu_dtype):
    """Plain tiled matmul against a pre-sampled weight matrix W (N, K)."""
    acc_ref = scratch[0] if scratch else None
    partial = lax.dot_general(
        x_ref[...].astype(mxu_dtype), w_ref[...].astype(mxu_dtype),
        dimension_numbers=(((1,), (1,)), ((), ())),
        preferred_element_type=jnp.float32)
    _accumulate(partial, b_ref, o_ref, acc_ref)


def _sample_weights_kernel(mu_ref, rho_ref, eps_ref, w_ref):
    """One-shot elementwise pass: W = mu + eps * (softplus(rho) + 1e-5)."""
    sigma = jax.nn.softplus(rho_ref[...].astype(jnp.float32)) + 1e-5
    w = mu_ref[...].astype(jnp.float32) + eps_ref[...].astype(jnp.float32) * sigma
    w_ref[...] = w.astype(w_ref.dtype)


# ---------------------------------------------------------------------------
# Wrappers
# ---------------------------------------------------------------------------
def _sample_weights(mu_p, rho_p, eps_p, tn, tk, out_dtype):
    Np, Kp = mu_p.shape
    spec = pl.BlockSpec((tn, tk), lambda i, j: (i, j))
    return pl.pallas_call(
        _sample_weights_kernel,
        grid_spec=pltpu.PrefetchScalarGridSpec(
            num_scalar_prefetch=0, grid=(Np // tn, Kp // tk),
            in_specs=[spec, spec, spec], out_specs=spec),
        out_shape=jax.ShapeDtypeStruct((Np, Kp), out_dtype),
        compiler_params=pltpu.CompilerParams(
            dimension_semantics=("parallel", "parallel")),
    )(mu_p, rho_p, eps_p)


def bayes_linear_forward(x, weight_mu, weight_rho, bias=None, eps=None, seed=0,
                         *, tm=256, tn=512, tk=512, mxu_dtype=jnp.bfloat16):
    """BayesLinear (BBB) forward:  y = x @ (mu + eps*(softplus(rho)+1e-5)).T + b.

    x:          (B, in_features)
    weight_mu:  (out_features, in_features)
    weight_rho: (out_features, in_features)
    bias:       (out_features,) or None
    eps:        optional precomputed N(0,1) sample, shape (out, in). If None,
                eps is drawn with jax.random from `seed` (per-call sample,
                matching the PyTorch module).
    mxu_dtype:  operand dtype fed to the MXU (bf16 recommended on v6e/v7x;
                pass jnp.float32 for closest parity with the f32 module).

    Performance notes: mu/rho (and eps) may be stored in bf16 by the caller to
    halve HBM traffic — the kernel upcasts to f32 before the reparameterization.
    """
    M, K = x.shape
    N = weight_mu.shape[0]
    if bias is None:
        bias = jnp.zeros((N,), x.dtype)
    if eps is None:
        eps = jax.random.normal(jax.random.PRNGKey(seed), (N, K), jnp.float32)

    # Lane-dense tiling: tn/tk multiples of 128, tm multiple of 8; prefer tiles
    # that divide the (aligned) problem dims so the pad/slice passes vanish.
    tm = _pick_tile(M, tm, 8)
    tn = _pick_tile(N, tn, 128)
    tk = _pick_tile(K, tk, 128)
    Mp, Np, Kp = _round_up(M, tm), _round_up(N, tn), _round_up(K, tk)
    grid = (Mp // tm, Np // tn, Kp // tk)
    grid_m = grid[0]

    xp = _pad2(x, Mp, Kp)
    bp = (bias if N == Np else jnp.pad(bias, (0, Np - N))).reshape(1, Np)

    out_dtype = x.dtype
    use_acc_scratch = jnp.dtype(out_dtype) != jnp.dtype(jnp.float32)
    scratch = [pltpu.VMEM((tm, tn), jnp.float32)] if use_acc_scratch else []

    x_spec = pl.BlockSpec((tm, tk), lambda i, j, k: (i, k))
    w_spec = pl.BlockSpec((tn, tk), lambda i, j, k: (j, k))
    b_spec = pl.BlockSpec((1, tn), lambda i, j, k: (0, j))
    o_spec = pl.BlockSpec((tm, tn), lambda i, j, k: (i, j))

    fused = grid_m == 1
    n_w_streams = 3 if fused else 1
    # Double-buffered inputs + output (+ accumulator), f32 worst case, headroom.
    est = 4 * (2 * tm * tk + 2 * n_w_streams * tn * tk + 2 * tn + 2 * tm * tn)
    est += (4 * tm * tn if use_acc_scratch else 0) + (4 << 20)
    compiler_params = pltpu.CompilerParams(
        dimension_semantics=("parallel", "parallel", "arbitrary"),
        vmem_limit_bytes=int(min(max(est, 32 << 20), 48 << 20)))  # <=48MiB for v7x

    out_shape = jax.ShapeDtypeStruct((Mp, Np), out_dtype)

    if fused:
        # Single M pass: fuse sampling into the matmul (mu/rho/eps streamed once).
        mup = _pad2(weight_mu, Np, Kp)
        rhop = _pad2(weight_rho, Np, Kp)
        epsp = _pad2(eps, Np, Kp)
        grid_spec = pltpu.PrefetchScalarGridSpec(
            num_scalar_prefetch=0, grid=grid,
            in_specs=[x_spec, w_spec, w_spec, w_spec, b_spec],
            out_specs=o_spec, scratch_shapes=scratch)
        out = pl.pallas_call(
            functools.partial(_bayes_linear_fused_kernel, mxu_dtype=mxu_dtype),
            grid_spec=grid_spec, out_shape=out_shape,
            compiler_params=compiler_params,
        )(xp, mup, rhop, epsp, bp)
    else:
        # Many M passes: sample W once (one elementwise pass, stored in the MXU
        # dtype) and stream a single weight tensor into the matmul.
        wp = _sample_weights(_pad2(weight_mu, Np, Kp),
                             _pad2(weight_rho, Np, Kp),
                             _pad2(eps, Np, Kp), tn, tk, mxu_dtype)
        grid_spec = pltpu.PrefetchScalarGridSpec(
            num_scalar_prefetch=0, grid=grid,
            in_specs=[x_spec, w_spec, b_spec],
            out_specs=o_spec, scratch_shapes=scratch)
        out = pl.pallas_call(
            functools.partial(_bayes_linear_w_kernel, mxu_dtype=mxu_dtype),
            grid_spec=grid_spec, out_shape=out_shape,
            compiler_params=compiler_params,
        )(xp, wp, bp)

    if (Mp, Np) != (M, N):
        out = out[:M, :N]
    return out


if __name__ == "__main__":
    # Module hyperparameters (defaults from BayesLinear.__init__)
    in_features, out_features = 32, 16
    batch = 8
    log_sigma1, log_sigma2, prior_pi = -1.0, -7.0, 0.25
    sigma1, sigma2 = math.exp(log_sigma1), math.exp(log_sigma2)
    sigma_mix = math.sqrt(prior_pi * sigma1 ** 2 + (1.0 - prior_pi) * sigma2 ** 2)
    rho_max_init = math.log(math.exp(sigma_mix / 1.0) - 1.0)
    rho_min_init = math.log(math.exp(sigma_mix / 2.0) - 1.0)
    initrange = 0.05

    key = jax.random.PRNGKey(0)
    k_mu, k_rho, k_eps, k_x, k_xb = jax.random.split(key, 5)

    # Deterministic parameter init mirroring reset_parameters()
    weight_mu = jax.random.uniform(
        k_mu, (out_features, in_features), jnp.float32, -initrange, initrange)
    weight_rho = jax.random.uniform(
        k_rho, (out_features, in_features), jnp.float32, rho_min_init, rho_max_init)
    bias = jnp.zeros((out_features,), jnp.float32)

    # eps ~ N(0,1) (per-forward-call weight-noise sample)
    eps = jax.random.normal(k_eps, (out_features, in_features), jnp.float32)
    x = jax.random.normal(k_x, (batch, in_features), jnp.float32)

    # Pure-JAX reference (high-precision matmul so the f32 check is meaningful)
    sigma = jax.nn.softplus(weight_rho) + 1e-5
    w = weight_mu + eps * sigma
    ref = jnp.dot(x, w.T, precision=lax.Precision.HIGHEST) + bias

    # 1) Fused path (single M block), f32 MXU operands: exact-semantics check.
    out_f32 = bayes_linear_forward(x, weight_mu, weight_rho, bias, eps=eps,
                                   mxu_dtype=jnp.float32)
    out_f32 = jax.block_until_ready(out_f32)
    assert out_f32.shape == (batch, out_features)
    assert jnp.allclose(out_f32, ref, atol=2e-3, rtol=2e-3), "f32 fused mismatch"

    # 2) bf16 MXU-operand path (v6e/v7x recommendation): looser tolerance.
    out_bf = bayes_linear_forward(x, weight_mu, weight_rho, bias, eps=eps,
                                  mxu_dtype=jnp.bfloat16)
    out_bf = jax.block_until_ready(out_bf)
    assert jnp.allclose(out_bf, ref, atol=5e-2, rtol=5e-2), "bf16 fused mismatch"

    # 3) Larger M: exercises the pre-sampled-W path (W streamed once per k-step,
    #    not re-sampled per M block).
    big_batch = 640
    xb = jax.random.normal(k_xb, (big_batch, in_features), jnp.float32)
    refb = jnp.dot(xb, w.T, precision=lax.Precision.HIGHEST) + bias
    out_big = bayes_linear_forward(xb, weight_mu, weight_rho, bias, eps=eps,
                                   mxu_dtype=jnp.float32)
    out_big = jax.block_until_ready(out_big)
    assert out_big.shape == (big_batch, out_features)
    assert jnp.allclose(out_big, refb, atol=2e-3, rtol=2e-3), "W-path mismatch"

    # 4) Non-f32 output dtype: exercises the f32 scratch-accumulator finalize.
    xb16 = x.astype(jnp.bfloat16)
    ref_b16 = jnp.dot(xb16.astype(jnp.float32), w.T,
                      precision=lax.Precision.HIGHEST) + bias
    out_b16 = bayes_linear_forward(xb16, weight_mu, weight_rho, bias, eps=eps,
                                   mxu_dtype=jnp.bfloat16)
    out_b16 = jax.block_until_ready(out_b16)
    assert out_b16.dtype == jnp.bfloat16
    assert jnp.allclose(out_b16.astype(jnp.float32), ref_b16,
                        atol=8e-2, rtol=8e-2), "bf16-output path mismatch"

    # 5) eps=None: eps drawn in the wrapper from `seed` (per-call sample).
    out_s = bayes_linear_forward(x, weight_mu, weight_rho, bias, eps=None,
                                 seed=1234, mxu_dtype=jnp.float32)
    out_s = jax.block_until_ready(out_s)
    mean_out = x @ weight_mu.T + bias
    assert out_s.shape == (batch, out_features)
    assert bool(jnp.all(jnp.isfinite(out_s)))
    assert float(jnp.std(out_s - mean_out)) > 0.0  # noise actually sampled

    print("KERNEL_OK")
</pallas_src>

<mosaic_0001>
module attributes {stable_mosaic.version = 11 : i64} {
  func.func @_bayes_linear_fused_kernel(%arg0: i32, %arg1: i32, %arg2: i32, %arg3: memref<8x128xf32, #tpu.memory_space<vmem>>, %arg4: memref<128x128xf32, #tpu.memory_space<vmem>>, %arg5: memref<128x128xf32, #tpu.memory_space<vmem>>, %arg6: memref<128x128xf32, #tpu.memory_space<vmem>>, %arg7: memref<1x128xf32, #tpu.memory_space<vmem>>, %arg8: memref<8x128xf32, #tpu.memory_space<vmem>>) attributes {dimension_semantics = [#tpu.dimension_semantics<parallel>, #tpu.dimension_semantics<parallel>, #tpu.dimension_semantics<arbitrary>], iteration_bounds = array<i64: 1, 1, 1>, scalar_prefetch = 0 : i64, scratch_operands = 0 : i64, tpu.core_type = #tpu.core_type<tc>, window_params = [{transform_indices = @transform_0, window_bounds = array<i64: 8, 128>}, {transform_indices = @transform_1, window_bounds = array<i64: 128, 128>}, {transform_indices = @transform_2, window_bounds = array<i64: 128, 128>}, {transform_indices = @transform_3, window_bounds = array<i64: 128, 128>}, {transform_indices = @transform_4, window_bounds = array<i64: 1, 128>}, {transform_indices = @transform_5, window_bounds = array<i64: 8, 128>}]} {
    %c0 = arith.constant 0 : index
    %c0_0 = arith.constant 0 : index
    %0 = vector.load %arg4[%c0, %c0_0] : memref<128x128xf32, #tpu.memory_space<vmem>>, vector<128x128xf32>
    %c0_1 = arith.constant 0 : index
    %c0_2 = arith.constant 0 : index
    %1 = vector.load %arg5[%c0_1, %c0_2] : memref<128x128xf32, #tpu.memory_space<vmem>>, vector<128x128xf32>
    %c0_3 = arith.constant 0 : index
    %c0_4 = arith.constant 0 : index
    %2 = vector.load %arg6[%c0_3, %c0_4] : memref<128x128xf32, #tpu.memory_space<vmem>>, vector<128x128xf32>
    %cst = arith.constant 0.000000e+00 : f32
    %3 = vector.broadcast %cst : f32 to vector<128x128xf32>
    %4 = arith.maximumf %1, %3 : vector<128x128xf32>
    %5 = vector.broadcast %cst : f32 to vector<128x128xf32>
    %6 = arith.subf %1, %5 : vector<128x128xf32>
    %7 = arith.cmpf one, %6, %6 : vector<128x128xf32>
    %8 = vector.broadcast %cst : f32 to vector<128x128xf32>
    %9 = arith.addf %1, %8 : vector<128x128xf32>
    %10 = math.absf %6 : vector<128x128xf32>
    %cst_5 = arith.constant 0.000000e+00 : f32
    %11 = vector.broadcast %cst_5 : f32 to vector<128x128xf32>
    %12 = arith.subf %11, %10 : vector<128x128xf32>
    %13 = math.exp %12 : vector<128x128xf32>
    %14 = math.log1p %13 : vector<128x128xf32>
    %15 = arith.addf %4, %14 : vector<128x128xf32>
    %16 = arith.select %7, %9, %15 : vector<128x128xi1>, vector<128x128xf32>
    %cst_6 = arith.constant 9.99999974E-6 : f32
    %17 = vector.broadcast %cst_6 : f32 to vector<128x128xf32>
    %18 = arith.addf %16, %17 : vector<128x128xf32>
    %19 = arith.mulf %2, %18 : vector<128x128xf32>
    %20 = arith.addf %0, %19 : vector<128x128xf32>
    %c0_7 = arith.constant 0 : index
    %c0_8 = arith.constant 0 : index
    %21 = vector.load %arg3[%c0_7, %c0_8] : memref<8x128xf32, #tpu.memory_space<vmem>>, vector<8x128xf32>
    %cst_9 = arith.constant dense<0.000000e+00> : vector<8x128xf32>
    %22 = tpu.matmul %21, %20, %cst_9 {dimension_numbers = #tpu.dot_dimension_numbers<[1], [1], [0], [0], [0, 0, 1, 0], [], []>} : vector<8x128xf32>, vector<128x128xf32>, vector<8x128xf32> -> vector<8x128xf32>
    %c0_i32 = arith.constant 0 : i32
    %23 = arith.cmpi eq, %arg2, %c0_i32 : i32
    %24 = arith.extui %23 : i1 to i32
    %c0_i32_10 = arith.constant 0 : i32
    %25 = arith.cmpi ne, %24, %c0_i32_10 : i32
    scf.if %25 {
      %c0_15 = arith.constant 0 : index
      %c0_16 = arith.constant 0 : index
      %29 = vector.load %arg7[%c0_15, %c0_16] : memref<1x128xf32, #tpu.memory_space<vmem>>, vector<1x128xf32>
      %30 = vector.shape_cast %29 : vector<1x128xf32> to vector<1x128xf32>
      %31 = vector.broadcast %30 : vector<1x128xf32> to vector<8x128xf32>
      %c0_17 = arith.constant 0 : index
      %c0_18 = arith.constant 0 : index
      %32 = vector.load %arg8[%c0_17, %c0_18] : memref<8x128xf32, #tpu.memory_space<vmem>>, vector<8x128xf32>
      tpu.vector_store %arg8[%c0_17, %c0_18], %31 {strides = array<i32>} : memref<8x128xf32, #tpu.memory_space<vmem>>, vector<8x128xf32>,
    } else {
    }
    %c0_11 = arith.constant 0 : index
    %c0_12 = arith.constant 0 : index
    %26 = vector.load %arg8[%c0_11, %c0_12] : memref<8x128xf32, #tpu.memory_space<vmem>>, vector<8x128xf32>
    %27 = arith.addf %26, %22 : vector<8x128xf32>
    %c0_13 = arith.constant 0 : index
    %c0_14 = arith.constant 0 : index
    %28 = vector.load %arg8[%c0_13, %c0_14] : memref<8x128xf32, #tpu.memory_space<vmem>>, vector<8x128xf32>
    tpu.vector_store %arg8[%c0_13, %c0_14], %27 {strides = array<i32>} : memref<8x128xf32, #tpu.memory_space<vmem>>, vector<8x128xf32>,
    return
  }
  func.func @transform_0(%arg0: i32, %arg1: i32, %arg2: i32) -> (i32, i32) {
    %c0_i32 = arith.constant 0 : i32
    return %arg0, %arg2 : i32, i32
  }
  func.func @transform_1(%arg0: i32, %arg1: i32, %arg2: i32) -> (i32, i32) {
    %c0_i32 = arith.constant 0 : i32
    return %arg1, %arg2 : i32, i32
  }
  func.func @transform_2(%arg0: i32, %arg1: i32, %arg2: i32) -> (i32, i32) {
    %c0_i32 = arith.constant 0 : i32
    return %arg1, %arg2 : i32, i32
  }
  func.func @transform_3(%arg0: i32, %arg1: i32, %arg2: i32) -> (i32, i32) {
    %c0_i32 = arith.constant 0 : i32
    return %arg1, %arg2 : i32, i32
  }
  func.func @transform_4(%arg0: i32, %arg1: i32, %arg2: i32) -> (i32, i32) {
    %c0_i32 = arith.constant 0 : i32
    %c0_i32_0 = arith.constant 0 : i32
    return %c0_i32, %arg1 : i32, i32
  }
  func.func @transform_5(%arg0: i32, %arg1: i32, %arg2: i32) -> (i32, i32) {
    %c0_i32 = arith.constant 0 : i32
    return %arg0, %arg1 : i32, i32
  }
}

</mosaic_0001>

<bundles_post_ra>
// kernel: tpu_custom_call.1
= control target key start
LH: loop header
LB: loop body
LE: loop exit
PB: predicated region body
PF: predicated region fallthrough
CT: control target
= control target key end

     0   :  { %10 = vsyncpa [#allocation3], 0  ;;  %s1034_s0 = inlined_call_operand.hbm [shape: f32[8,128], index: 0, kind: input, shape index: {}]   ;;  %s1035_s1 = inlined_call_operand.hbm [shape: f32[128,128], index: 1, kind: input, shape index: {}]   ;;  %s1036_s2 = inlined_call_operand.hbm [shape: f32[128,128], index: 2, kind: input, shape index: {}]   ;;  %s1037_s3 = inlined_call_operand.hbm [shape: f32[128,128], index: 3, kind: input, shape index: {}]   ;;  %s1038_s4 = inlined_call_operand.vmem [shape: f32[1,128], index: 4, kind: input, shape index: {}]   ;;  %s1039_s5 = inlined_call_operand.hbm [shape: f32[8,128], index: 5, kind: output, shape index: {}]  }
   0x1   :  { %11 = vsyncpa [#allocation6], 0 }
   0x2   :  { %12 = vsyncpa [#allocation9], 0  ;;  %s29_s20 = sshll.u32 %s1035_s1, 4  ;;  %s30_s20 = int_to_ptr.hbm [resolvable:$true] %s29_s20 }
   0x3   :  { %13 = vsyncpa [#allocation4], 0  ;;  %s718_s21 = smov [#allocation5]   ;;  %s19_s25 = sshll.u32 %s1034_s0, 4  ;;  %s20_s25 = int_to_ptr.hbm [resolvable:$true] %s19_s25 }
   0x4   :  { %s31_s22 = sshll.u32 %s718_s21, 4  ;;  %s719_s26 = smov 128   ;;  %s32_s22 = int_to_ptr.vmem [resolvable:$true] %s31_s22 }
   0x5   :  { %s720_s27 = smov 8   ;;  %s721_s28 = smov [#allocation2]  }
   0x6   :  { %37 = dma.hbm_to_vmem [thread:$0]  %s30_s20, 2048, %s32_s22, [#allocation6], %s719_s26, %s719_s26, %s720_s27  }
   0x7   :  { %s21_s29 = sshll.u32 %s721_s28, 4  ;;  %s42_s7 = sshll.u32 %s1036_s2, 4  ;;  %s22_s29 = int_to_ptr.vmem [resolvable:$true] %s21_s29  ;;  %s43_s7 = int_to_ptr.hbm [resolvable:$true] %s42_s7 }
   0x8   :  { %24 = dma.hbm_to_vmem [thread:$0]  %s20_s25, 128, %s22_s29, [#allocation3]  }
   0x9   :  { %s55_s9 = sshll.u32 %s1037_s3, 4  ;;  %s722_s10 = smov [#allocation7]   ;;  %s56_s9 = int_to_ptr.hbm [resolvable:$true] %s55_s9 }
   0xa   :  { %s44_s11 = sshll.u32 %s722_s10, 4  ;;  %s723_s0 = smov [#allocation8]   ;;  %s45_s11 = int_to_ptr.vmem [resolvable:$true] %s44_s11 }
   0xb   :  { %50 = dma.hbm_to_vmem [thread:$0]  %s43_s7, 2048, %s45_s11, [#allocation6], %s719_s26, %s719_s26, %s720_s27  }
   0xc   :  { %s57_s12 = sshll.u32 %s723_s0, 4  ;;  %s58_s12 = int_to_ptr.vmem [resolvable:$true] %s57_s12 }
   0xd   :  { %63 = dma.hbm_to_vmem [thread:$0]  %s56_s9, 2048, %s58_s12, [#allocation9], %s719_s26, %s719_s26, %s720_s27  }
   0xe   :  { %710 = dma.done.wait [#allocation3], 128  }
   0xf   :  { %711 = vsyncadd [#allocation3], 4294967168 }
  0x10   :  { %712 = dma.done.wait [#allocation6], 4096  }
  0x11   :  { %713 = vsyncadd [#allocation6], 4294963200 }
  0x12   :  { %714 = dma.done.wait [#allocation9], 2048  }
  0x13   :  { %715 = vsyncadd [#allocation9], 4294965248  ;;  %v767_v0 = vld [vmem:[#allocation7 + $0x78] sm:$0xff]  ;;  %v770_v2 = vld [vmem:[#allocation7 + $0x70] sm:$0xff]  ;;  %s724_s13 = smov [#allocation10]   ;;  %s506_s17 = sshll.u32 %s1039_s5, 4  ;;  %s507_s17 = int_to_ptr.hbm [resolvable:$true] %s506_s17 }
  0x14   :  { %v193_v1 = vand.u32 2147483647, %v767_v0  ;;  %v772_v3 = vld [vmem:[#allocation7 + $0x68] sm:$0xff]  ;;  %v774_v4 = vld [vmem:[#allocation7 + $0x60] sm:$0xff]  ;;  %v192_v5 = vand.u32 2147483647, %v770_v2  ;;  %vm161_vm0 = vcmp.ne.f32.partialorder %v767_v0, %v767_v0  ;;  %vm160_vm2 = vcmp.ne.f32.partialorder %v770_v2, %v770_v2 }
  0x15   :  { %v777_v6 = vld [vmem:[#allocation7 + $0x58] sm:$0xff]  ;;  %v191_v8 = vand.u32 2147483647, %v772_v3  ;;  %v190_v9 = vand.u32 2147483647, %v774_v4  ;;  %v782_v12 = vld [vmem:[#allocation7 + $0x50] sm:$0xff]  ;;  %vm159_vm4 = vcmp.ne.f32.partialorder %v772_v3, %v772_v3  ;;  %vm158_vm6 = vcmp.ne.f32.partialorder %v774_v4, %v774_v4 }
  0x16   :  { %v209_v7 = vsub.f32 0.0, %v193_v1  ;;  %v208_v10 = vsub.f32 0.0, %v192_v5  ;;  %v189_v11 = vand.u32 2147483647, %v777_v6  ;;  %v784_v13 = vld [vmem:[#allocation7 + $0x48] sm:$0xff]  ;;  %v788_v23 = vld [vmem:[#allocation7 + $0x40] sm:$0xff]  ;;  %vm157_vm8 = vcmp.ne.f32.partialorder %v777_v6, %v777_v6 }
  0x17   :  { %v207_v15 = vsub.f32 0.0, %v191_v8  ;;  %v206_v16 = vsub.f32 0.0, %v190_v9  ;;  %v188_v17 = vand.u32 2147483647, %v782_v12  ;;  %v187_v20 = vand.u32 2147483647, %v784_v13 }
  0x18   :  { %v240_v14 = vmul.f32 1.442695, %v209_v7  ;;  %v238_v18 = vmul.f32 1.442695, %v208_v10  ;;  %v205_v19 = vsub.f32 0.0, %v189_v11  ;;  %v791_v29 = vld [vmem:[#allocation7 + $0x38] sm:$0xff]  ;;  %vm156_vm11 = vcmp.ne.f32.partialorder %v782_v12, %v782_v12 }
  0x19   :  { %v236_v21 = vmul.f32 1.442695, %v207_v15  ;;  %v234_v22 = vmul.f32 1.442695, %v206_v16  ;;  %v204_v25 = vsub.f32 0.0, %v188_v17  ;;  %v203_v26 = vsub.f32 0.0, %v187_v20 }
  0x1a   :  { %526 = vpow2.f32 %v240_v14  ;;  %v232_v24 = vmul.f32 1.442695, %v205_v19  ;;  %v186_v27 = vand.u32 2147483647, %v788_v23  ;;  %v793_v31 = vld [vmem:[#allocation7 + $0x30] sm:$0xff]  ;;  %v145_v32 = vmax.f32 %v767_v0, 0.0 }
  0x1b   :  { %528 = vpow2.f32 %v238_v18  ;;  %v230_v28 = vmul.f32 1.442695, %v204_v25  ;;  %v228_v30 = vmul.f32 1.442695, %v203_v26  ;;  %v144_v33 = vmax.f32 %v770_v2, 0.0  ;;  %v96_v11 = vld [vmem:[#allocation5 + $0x70] sm:$0xff] }
  0x1c   :  { %530 = vpow2.f32 %v236_v21  ;;  %v143_v34 = vmax.f32 %v772_v3, 0.0  ;;  %v142_v35 = vmax.f32 %v774_v4, 0.0  ;;  %v141_v37 = vmax.f32 %v777_v6, 0.0  ;;  %s504_s14 = sshll.u32 %s724_s13, 4  ;;  %s505_s14 = int_to_ptr.vmem [resolvable:$true] %s504_s14 }
  0x1d   :  { %532 = vpow2.f32 %v234_v22  ;;  %v202_v38 = vsub.f32 0.0, %v186_v27  ;;  %v185_v39 = vand.u32 2147483647, %v791_v29  ;;  %v184_v44 = vand.u32 2147483647, %v793_v31 }
  0x1e   :  { %534 = vpow2.f32 %v232_v24  ;;  %v140_v52 = vmax.f32 %v782_v12, 0.0  ;;  %vm155_vm13 = vcmp.ne.f32.partialorder %v784_v13, %v784_v13  ;;  %vm154_vm14 = vcmp.ne.f32.partialorder %v788_v23, %v788_v23 }
  0x1f   :  { %536 = vpow2.f32 %v230_v28  ;;  %v805_v56 = vmul.f32 1.442695, %v202_v38  ;;  %vm153_vm15 = vcmp.ne.f32.partialorder %v791_v29, %v791_v29 }
  0x20   :  { %v527_v36 = vpop.eup %526  ;;  %538 = vpow2.f32 %v228_v30 }
  0x21   :  { %v529_v40 = vpop.eup %528  ;;  %v377_v41 = vadd.f32 1.0, %v527_v36  ;;  %v380_v42 = vmul.f32 -0.5, %v527_v36  ;;  %v383_v43 = vand.u32 2147483647, %v527_v36 }
  0x22   :  { %v531_v45 = vpop.eup %530  ;;  %v368_v46 = vadd.f32 1.0, %v529_v40  ;;  %v371_v47 = vmul.f32 -0.5, %v529_v40  ;;  %v374_v48 = vand.u32 2147483647, %v529_v40 }
  0x23   :  { %v533_v49 = vpop.eup %532  ;;  %540 = vlog2.f32 %v377_v41  ;;  %v381_v50 = vadd.f32 1.0, %v380_v42  ;;  %v359_v51 = vadd.f32 1.0, %v531_v45  ;;  %v362_v55 = vmul.f32 -0.5, %v531_v45 }
  0x24   :  { %v535_v53 = vpop.eup %534  ;;  %542 = vlog2.f32 %v368_v46  ;;  %v372_v54 = vadd.f32 1.0, %v371_v47  ;;  %vm807_vm1 = vcmp.lt.f32.partialorder %v383_v43, 0.0004427343  ;;  %v365_v58 = vand.u32 2147483647, %v531_v45 }
  0x25   :  { %544 = vlog2.f32 %v359_v51  ;;  %v350_v59 = vadd.f32 1.0, %v533_v49  ;;  %v537_v60 = vpop.eup %536  ;;  %vm813_vm3 = vcmp.lt.f32.partialorder %v374_v48, 0.0004427343  ;;  %v363_v62 = vadd.f32 1.0, %v362_v55 }
  0x26   :  { %v353_v63 = vmul.f32 -0.5, %v533_v49  ;;  %v356_v1 = vand.u32 2147483647, %v533_v49  ;;  %v382_v5 = vmul.f32 %v527_v36, %v381_v50  ;;  %v341_v7 = vadd.f32 1.0, %v535_v53  ;;  %v819_v9 = vpop.eup %538 }
  0x27   :  { %546 = vlog2.f32 %v350_v59  ;;  %v344_v8 = vmul.f32 -0.5, %v535_v53  ;;  %v373_v10 = vmul.f32 %v529_v40, %v372_v54  ;;  %vm821_vm5 = vcmp.lt.f32.partialorder %v365_v58, 0.0004427343  ;;  %v129_v54 = vld [vmem:[#allocation8 + $0x78] sm:$0xff]  ;;  %v128_v59 = vld [vmem:[#allocation8 + $0x70] sm:$0xff] }
  0x28   :  { %v354_v14 = vadd.f32 1.0, %v353_v63  ;;  %v347_v15 = vand.u32 2147483647, %v535_v53  ;;  %548 = vlog2.f32 %v341_v7  ;;  %v332_v18 = vadd.f32 1.0, %v537_v60 }
  0x29   :  { %v541_v16 = vpop.eup %540  ;;  %v345_v17 = vadd.f32 1.0, %v344_v8  ;;  %v335_v19 = vmul.f32 -0.5, %v537_v60  ;;  %v364_v22 = vmul.f32 %v531_v45, %v363_v62  ;;  %vm827_vm7 = vcmp.lt.f32.partialorder %v356_v1, 0.0004427343 }
  0x2a   :  { %v543_v20 = vpop.eup %542  ;;  %v379_v21 = vmul.f32 0.6931472, %v541_v16  ;;  %v338_v25 = vand.u32 2147483647, %v537_v60  ;;  %v355_v28 = vmul.f32 %v533_v49, %v354_v14  ;;  %550 = vlog2.f32 %v332_v18 }
  0x2b   :  { %v545_v26 = vpop.eup %544  ;;  %v370_v27 = vmul.f32 0.6931472, %v543_v20  ;;  %v336_v30 = vadd.f32 1.0, %v335_v19  ;;  %v346_v40 = vmul.f32 %v535_v53, %v345_v17  ;;  %vm835_vm9 = vcmp.lt.f32.partialorder %v347_v15, 0.0004427343  ;;  %v127_v15 = vld [vmem:[#allocation8 + $0x68] sm:$0xff] }
  0x2c   :  { %v385_v36 = vsel %vm807_vm1, %v382_v5, %v379_v21  ;;  %v361_v38 = vmul.f32 0.6931472, %v545_v26  ;;  %vm843_vm10 = vcmp.lt.f32.partialorder %v338_v25, 0.0004427343  ;;  %v323_v51 = vadd.f32 1.0, %v819_v9 }
  0x2d   :  { %v547_v42 = vpop.eup %546  ;;  %v401_v43 = vadd.f32 %v385_v36, %v145_v32  ;;  %v376_v45 = vsel %vm813_vm3, %v373_v10, %v370_v27  ;;  %v337_v46 = vmul.f32 %v537_v60, %v336_v30  ;;  %v326_v57 = vmul.f32 -0.5, %v819_v9  ;;  %v95_v27 = vld [vmem:[#allocation5 + $0x68] sm:$0xff] }
  0x2e   :  { %v400_v48 = vadd.f32 %v376_v45, %v144_v33  ;;  %v367_v49 = vsel %vm821_vm5, %v364_v22, %v361_v38  ;;  %v352_v50 = vmul.f32 0.6931472, %v547_v42  ;;  %v549_v53 = vpop.eup %548  ;;  %v329_v33 = vand.u32 2147483647, %v819_v9  ;;  %v94_v45 = vld [vmem:[#allocation5 + $0x60] sm:$0xff] }
  0x2f   :  { %v417_v32 = vsel %vm161_vm0, %v767_v0, %v401_v43  ;;  %v399_v55 = vadd.f32 %v367_v49, %v143_v34  ;;  %v343_v62 = vmul.f32 0.6931472, %v549_v53  ;;  %v97_v0 = vld [vmem:[#allocation5 + $0x78] sm:$0xff]  ;;  %552 = vlog2.f32 %v323_v51  ;;  %v124_v49 = vld [vmem:[#allocation8 + $0x50] sm:$0xff] }
  0x30   :  { %v433_v58 = vadd.f32 1e-05, %v417_v32  ;;  %v416_v60 = vsel %vm160_vm2, %v770_v2, %v400_v48  ;;  %v358_v61 = vsel %vm827_vm7, %v355_v28, %v352_v50  ;;  %v551_v63 = vpop.eup %550  ;;  %v327_v17 = vadd.f32 1.0, %v326_v57  ;;  %v93_v53 = vld [vmem:[#allocation5 + $0x58] sm:$0xff] }
  0x31   :  { %v432_v1 = vadd.f32 1e-05, %v416_v60  ;;  %v415_v34 = vsel %vm159_vm4, %v772_v3, %v399_v55  ;;  %v398_v5 = vadd.f32 %v358_v61, %v142_v35  ;;  %v349_v2 = vsel %vm835_vm9, %v346_v40, %v343_v62  ;;  %v125_v40 = vld [vmem:[#allocation8 + $0x58] sm:$0xff] }
  0x32   :  { %v449_v7 = vmul.f32 %v433_v58, %v129_v54  ;;  %v431_v8 = vadd.f32 1e-05, %v415_v34  ;;  %v334_v10 = vmul.f32 0.6931472, %v551_v63  ;;  %v397_v3 = vadd.f32 %v349_v2, %v141_v37  ;;  %v892_v37 = vld [vmem:[#allocation7 + $0x28] sm:$0xff] }
  0x33   :  { %v448_v14 = vmul.f32 %v432_v1, %v128_v59  ;;  %v414_v16 = vsel %vm158_vm6, %v774_v4, %v398_v5  ;;  %v201_v4 = vsub.f32 0.0, %v185_v39  ;;  %v328_v25 = vmul.f32 %v819_v9, %v327_v17  ;;  %v917_v59 = vld [vmem:[#allocation7 + $0x18] sm:$0xff]  ;;  %v92_v1 = vld [vmem:[#allocation5 + $0x50] sm:$0xff]  ;;  %v123_v34 = vld [vmem:[#allocation8 + $0x48] sm:$0xff] }
  0x34   :  { %v465_v35 = vadd.f32 %v449_v7, %v97_v0  ;;  %v340_v18 = vsel %vm843_vm10, %v337_v46, %v334_v10  ;;  %v413_v19 = vsel %vm157_vm8, %v777_v6, %v397_v3  ;;  %v447_v22 = vmul.f32 %v431_v8, %v127_v15  ;;  %v126_v6 = vld [vmem:[#allocation8 + $0x60] sm:$0xff] }
  0x35   :  { %v396_v20 = vadd.f32 %v340_v18, %v140_v52  ;;  %v464_v21 = vadd.f32 %v448_v14, %v96_v11  ;;  %v430_v24 = vadd.f32 1e-05, %v414_v16  ;;  %v553_v26 = vpop.eup %552  ;;  %v139_v28 = vmax.f32 %v784_v13, 0.0 }
  0x36   :  { %467 = vmatpush.xpose.msra.mxu0 %v465_v35  ;;  %vm896_vm12 = vcmp.lt.f32.partialorder %v329_v33, 0.0004427343  ;;  %554 = vpow2.f32 %v805_v56  ;;  %v200_v39 = vsub.f32 0.0, %v184_v44  ;;  %v429_v52 = vadd.f32 1e-05, %v413_v19  ;;  %v912_v56 = vld [vmem:[#allocation7 + $0x20] sm:$0xff] }
  0x37   :  { %v412_v9 = vsel %vm156_vm11, %v782_v12, %v396_v20  ;;  %v325_v36 = vmul.f32 0.6931472, %v553_v26  ;;  %v183_v38 = vand.u32 2147483647, %v892_v37  ;;  %v224_v41 = vmul.f32 1.442695, %v201_v4 }
  0x38   :  { %v463_v42 = vadd.f32 %v447_v22, %v95_v27  ;;  %v446_v43 = vmul.f32 %v430_v24, %v126_v6  ;;  %v428_v46 = vadd.f32 1e-05, %v412_v9  ;;  %v222_v12 = vmul.f32 1.442695, %v200_v39  ;;  %v925_v19 = vld [vmem:[#allocation7 + $0x10] sm:$0xff]  ;;  %v91_v20 = vld [vmem:[#allocation5 + $0x48] sm:$0xff] }
  0x39   :  { %v331_v44 = vsel %vm896_vm12, %v328_v25, %v325_v36  ;;  %556 = vpow2.f32 %v224_v41  ;;  %v445_v48 = vmul.f32 %v429_v52, %v125_v40  ;;  %v199_v50 = vsub.f32 0.0, %v183_v38  ;;  %v937_v40 = vld [vmem:[#allocation7 + $0x8] sm:$0xff]  ;;  %v88_v41 = vld [vmem:[#allocation5 + $0x30] sm:$0xff] }
  0x3a   :  { %468 = vmatpush.xpose.msra.mxu0 %v464_v21  ;;  %v395_v47 = vadd.f32 %v331_v44, %v139_v28  ;;  %558 = vpow2.f32 %v222_v12  ;;  %v182_v32 = vand.u32 2147483647, %v912_v56  ;;  %v462_v55 = vadd.f32 %v446_v43, %v94_v45 }
  0x3b   :  { %v138_v57 = vmax.f32 %v788_v23, 0.0  ;;  %v444_v60 = vmul.f32 %v428_v46, %v124_v49  ;;  %v220_v62 = vmul.f32 1.442695, %v199_v50  ;;  %v461_v0 = vadd.f32 %v445_v48, %v93_v53  ;;  %v949_v49 = vld [vmem:[#allocation7] sm:$0xff] }
  0x3c   :  { %v555_v51 = vpop.eup %554  ;;  %v411_v54 = vsel %vm155_vm13, %v784_v13, %v395_v47  ;;  %v198_v63 = vsub.f32 0.0, %v182_v32  ;;  %v137_v13 = vmax.f32 %v791_v29, 0.0  ;;  %v136_v5 = vmax.f32 %v793_v31, 0.0  ;;  %v122_v32 = vld [vmem:[#allocation8 + $0x40] sm:$0xff] }
  0x3d   :  { %v314_v33 = vadd.f32 1.0, %v555_v51  ;;  %v317_v58 = vmul.f32 -0.5, %v555_v51  ;;  %v427_v61 = vadd.f32 1e-05, %v411_v54  ;;  %v181_v10 = vand.u32 2147483647, %v917_v59 }
  0x3e   :  { %469 = vmatpush.xpose.msra.mxu0 %v463_v42  ;;  %v218_v2 = vmul.f32 1.442695, %v198_v63  ;;  %v320_v11 = vand.u32 2147483647, %v555_v51  ;;  %v135_v16 = vmax.f32 %v892_v37, 0.0  ;;  %v460_v17 = vadd.f32 %v444_v60, %v92_v1 }
  0x3f   :  { %560 = vlog2.f32 %v314_v33  ;;  %v557_v7 = vpop.eup %556  ;;  %v318_v8 = vadd.f32 1.0, %v317_v58  ;;  %v443_v35 = vmul.f32 %v427_v61, %v123_v34  ;;  %v197_v18 = vsub.f32 0.0, %v181_v10 }
  0x40   :  { %562 = vpow2.f32 %v220_v62  ;;  %v305_v14 = vadd.f32 1.0, %v557_v7  ;;  %v308_v15 = vmul.f32 -0.5, %v557_v7  ;;  %v559_v3 = vpop.eup %558  ;;  %v311_v4 = vand.u32 2147483647, %v557_v7 }
  0x41   :  { %564 = vpow2.f32 %v218_v2  ;;  %v296_v21 = vadd.f32 1.0, %v559_v3  ;;  %v299_v22 = vmul.f32 -0.5, %v559_v3  ;;  %v319_v24 = vmul.f32 %v555_v51, %v318_v8  ;;  %v90_v2 = vld [vmem:[#allocation5 + $0x40] sm:$0xff] }
  0x42   :  { %470 = vmatpush.xpose.msra.mxu0 %v462_v55  ;;  %566 = vlog2.f32 %v305_v14  ;;  %v309_v25 = vadd.f32 1.0, %v308_v15  ;;  %v302_v26 = vand.u32 2147483647, %v559_v3  ;;  %v216_v27 = vmul.f32 1.442695, %v197_v18 }
  0x43   :  { %vm929_vm0 = vcmp.lt.f32.partialorder %v320_v11, 0.0004427343  ;;  %568 = vlog2.f32 %v296_v21  ;;  %v300_v30 = vadd.f32 1.0, %v299_v22  ;;  %v180_v39 = vand.u32 2147483647, %v925_v19 }
  0x44   :  { %v459_v9 = vadd.f32 %v443_v35, %v91_v20  ;;  %vm152_vm1 = vcmp.ne.f32.partialorder %v793_v31, %v793_v31  ;;  %v134_v38 = vmax.f32 %v912_v56, 0.0  ;;  %570 = vpow2.f32 %v216_v27  ;;  %v121_v20 = vld [vmem:[#allocation8 + $0x38] sm:$0xff] }
  0x45   :  { %v561_v6 = vpop.eup %560  ;;  %vm939_vm2 = vcmp.lt.f32.partialorder %v311_v4, 0.0004427343  ;;  %v310_v47 = vmul.f32 %v557_v7, %v309_v25  ;;  %v301_v12 = vmul.f32 %v559_v3, %v300_v30  ;;  %vm945_vm3 = vcmp.lt.f32.partialorder %v302_v26, 0.0004427343  ;;  %v89_v27 = vld [vmem:[#allocation5 + $0x38] sm:$0xff] }
  0x46   :  { %471 = vmatpush.xpose.msra.mxu0 %v461_v0  ;;  %v563_v52 = vpop.eup %562  ;;  %v316_v36 = vmul.f32 0.6931472, %v561_v6  ;;  %v196_v53 = vsub.f32 0.0, %v180_v39  ;;  %v179_v54 = vand.u32 2147483647, %v937_v40  ;;  %vm151_vm4 = vcmp.ne.f32.partialorder %v892_v37, %v892_v37  ;;  %v120_v6 = vld [vmem:[#allocation8 + $0x30] sm:$0xff] }
  0x47   :  { %v287_v42 = vadd.f32 1.0, %v563_v52  ;;  %v290_v43 = vmul.f32 -0.5, %v563_v52  ;;  %v293_v44 = vand.u32 2147483647, %v563_v52  ;;  %v565_v45 = vpop.eup %564  ;;  %v178_v0 = vand.u32 2147483647, %v949_v49 }
  0x48   :  { %v322_v46 = vsel %vm929_vm0, %v319_v24, %v316_v36  ;;  %v567_v50 = vpop.eup %566  ;;  %v278_v58 = vadd.f32 1.0, %v565_v45  ;;  %v281_v60 = vmul.f32 -0.5, %v565_v45  ;;  %v284_v63 = vand.u32 2147483647, %v565_v45 }
  0x49   :  { %v394_v51 = vadd.f32 %v322_v46, %v138_v57  ;;  %572 = vlog2.f32 %v287_v42  ;;  %v307_v55 = vmul.f32 0.6931472, %v567_v50  ;;  %v291_v33 = vadd.f32 1.0, %v290_v43  ;;  %v569_v61 = vpop.eup %568  ;;  %v119_v50 = vld [vmem:[#allocation8 + $0x28] sm:$0xff] }
  0x4a   :  { %472 = vmatpush.xpose.msra.mxu0 %v460_v17  ;;  %vm960_vm5 = vcmp.lt.f32.partialorder %v293_v44, 0.0004427343  ;;  %v571_v1 = vpop.eup %570  ;;  %v298_v8 = vmul.f32 0.6931472, %v569_v61  ;;  %574 = vlog2.f32 %v278_v58  ;;  %vm150_vm6 = vcmp.ne.f32.partialorder %v912_v56, %v912_v56 }
  0x4b   :  { %v410_v62 = vsel %vm154_vm14, %v788_v23, %v394_v51  ;;  %v313_v7 = vsel %vm939_vm2, %v310_v47, %v307_v55  ;;  %v282_v23 = vadd.f32 1.0, %v281_v60  ;;  %v269_v11 = vadd.f32 1.0, %v571_v1  ;;  %v87_v60 = vld [vmem:[#allocation5 + $0x28] sm:$0xff] }
  0x4c   :  { %v426_v34 = vadd.f32 1e-05, %v410_v62  ;;  %v393_v10 = vadd.f32 %v313_v7, %v137_v13  ;;  %v214_v14 = vmul.f32 1.442695, %v196_v53  ;;  %v304_v3 = vsel %vm945_vm3, %v301_v12, %v298_v8  ;;  %v118_v62 = vld [vmem:[#allocation8 + $0x20] sm:$0xff] }
  0x4d   :  { %v292_v17 = vmul.f32 %v563_v52, %v291_v33  ;;  %v272_v35 = vmul.f32 -0.5, %v571_v1  ;;  %v392_v13 = vadd.f32 %v304_v3, %v136_v5  ;;  %576 = vlog2.f32 %v269_v11 }
  0x4e   :  { %473 = vmatpush.xpose.msra.mxu0 %v459_v9  ;;  %v442_v15 = vmul.f32 %v426_v34, %v122_v32  ;;  %v409_v4 = vsel %vm153_vm15, %v791_v29, %v393_v10  ;;  %v275_v21 = vand.u32 2147483647, %v571_v1  ;;  %v283_v30 = vmul.f32 %v565_v45, %v282_v23  ;;  %v117_v23 = vld [vmem:[#allocation8 + $0x18] sm:$0xff] }
  0x4f   :  { %v573_v18 = vpop.eup %572  ;;  %v425_v24 = vadd.f32 1e-05, %v409_v4  ;;  %v273_v26 = vadd.f32 1.0, %v272_v35  ;;  %v408_v28 = vsel %vm152_vm1, %v793_v31, %v392_v13  ;;  %578 = vpow2.f32 %v214_v14 }
  0x50   :  { %v458_v22 = vadd.f32 %v442_v15, %v90_v2  ;;  %v289_v25 = vmul.f32 0.6931472, %v573_v18  ;;  %v195_v39 = vsub.f32 0.0, %v179_v54  ;;  %v575_v29 = vpop.eup %574  ;;  %v424_v5 = vadd.f32 1e-05, %v408_v28  ;;  %v86_v2 = vld [vmem:[#allocation5 + $0x20] sm:$0xff] }
  0x51   :  { %v441_v52 = vmul.f32 %v425_v24, %v121_v20  ;;  %vm985_vm7 = vcmp.lt.f32.partialorder %v284_v63, 0.0004427343  ;;  %v280_v43 = vmul.f32 0.6931472, %v575_v29  ;;  %v133_v31 = vmax.f32 %v917_v59, 0.0  ;;  %v85_v20 = vld [vmem:[#allocation5 + $0x18] sm:$0xff] }
  0x52   :  { %474 = vmatpush.xpose.msra.mxu0 %v458_v22  ;;  %v295_v9 = vsel %vm960_vm5, %v292_v17, %v289_v25  ;;  %v212_v44 = vmul.f32 1.442695, %v195_v39  ;;  %v440_v46 = vmul.f32 %v424_v5, %v120_v6  ;;  %v274_v47 = vmul.f32 %v571_v1, %v273_v26 }
  0x53   :  { %v391_v42 = vadd.f32 %v295_v9, %v135_v16  ;;  %v457_v45 = vadd.f32 %v441_v52, %v89_v27  ;;  %vm992_vm8 = vcmp.lt.f32.partialorder %v275_v21, 0.0004427343  ;;  %v577_v48 = vpop.eup %576  ;;  %v286_v16 = vsel %vm985_vm7, %v283_v30, %v280_v43  ;;  %v116_v9 = vld [vmem:[#allocation8 + $0x10] sm:$0xff] }
  0x54   :  { %580 = vpow2.f32 %v212_v44  ;;  %v194_v53 = vsub.f32 0.0, %v178_v0  ;;  %v456_v54 = vadd.f32 %v440_v46, %v88_v41  ;;  %v390_v55 = vadd.f32 %v286_v16, %v134_v38 }
  0x55   :  { %v407_v51 = vsel %vm151_vm4, %v892_v37, %v391_v42  ;;  %v271_v33 = vmul.f32 0.6931472, %v577_v48  ;;  %v579_v58 = vpop.eup %578  ;;  %vm149_vm9 = vcmp.ne.f32.partialorder %v917_v59, %v917_v59  ;;  %v132_v22 = vmax.f32 %v925_v19, 0.0 }
  0x56   :  { %475 = vmatpush.xpose.msra.mxu0 %v457_v45  ;;  %v423_v32 = vadd.f32 1e-05, %v407_v51  ;;  %v406_v37 = vsel %vm150_vm6, %v912_v56, %v390_v55  ;;  %v260_v63 = vadd.f32 1.0, %v579_v58  ;;  %v263_v38 = vmul.f32 -0.5, %v579_v58 }
  0x57   :  { %v277_v57 = vsel %vm992_vm8, %v274_v47, %v271_v33  ;;  %v422_v0 = vadd.f32 1e-05, %v406_v37  ;;  %v210_v34 = vmul.f32 1.442695, %v194_v53  ;;  %v266_v15 = vand.u32 2147483647, %v579_v58 }
  0x58   :  { %v439_v61 = vmul.f32 %v423_v32, %v119_v50  ;;  %v389_v1 = vadd.f32 %v277_v57, %v133_v31  ;;  %582 = vlog2.f32 %v260_v63  ;;  %v264_v11 = vadd.f32 1.0, %v263_v38  ;;  %v84_v31 = vld [vmem:[#allocation5 + $0x10] sm:$0xff]  ;;  %v115_v47 = vld [vmem:[#allocation8 + $0x8] sm:$0xff]  ;;  %v466_v63 = vld [vmem:[#allocation2] sm:$0xff] }
  0x59   :  { %v438_v10 = vmul.f32 %v422_v0, %v118_v62  ;;  %584 = vpow2.f32 %v210_v34  ;;  %vm267_vm10 = vcmp.lt.f32.partialorder %v266_v15, 0.0004427343  ;;  %vm148_vm11 = vcmp.ne.f32.partialorder %v925_v19, %v925_v19  ;;  %v83_v53 = vld [vmem:[#allocation5 + $0x8] sm:$0xff]  ;;  %v82_v62 = vld [vmem:[#allocation5] sm:$0xff]  ;;  %v525_v0 = vld [vmem:[%s1038_s4] ss:$0 sm:$0xff] }
  0x5a   :  { %476 = vmatpush.xpose.msra.mxu0 %v456_v54  ;;  %v455_v7 = vadd.f32 %v439_v61, %v87_v60  ;;  %v581_v8 = vpop.eup %580  ;;  %v405_v56 = vsel %vm149_vm9, %v917_v59, %v389_v1  ;;  %v265_v4 = vmul.f32 %v579_v58, %v264_v11  ;;  %v131_v6 = vmax.f32 %v937_v40, 0.0  ;;  %v114_v60 = vld [vmem:[#allocation8] sm:$0xff] }
  0x5b   :  { %v421_v14 = vadd.f32 1e-05, %v405_v56  ;;  %v251_v3 = vadd.f32 1.0, %v581_v8  ;;  %v254_v17 = vmul.f32 -0.5, %v581_v8  ;;  %v454_v35 = vadd.f32 %v438_v10, %v86_v2 }
  0x5c   :  { %v257_v24 = vand.u32 2147483647, %v581_v8  ;;  %vm147_vm13 = vcmp.ne.f32.partialorder %v937_v40, %v937_v40  ;;  %vm146_vm15 = vcmp.ne.f32.partialorder %v949_v49, %v949_v49 }
  0x5d   :  { %v437_v18 = vmul.f32 %v421_v14, %v117_v23  ;;  %586 = vlog2.f32 %v251_v3  ;;  %v255_v13 = vadd.f32 1.0, %v254_v17 }
  0x5e   :  { %477 = vmatpush.xpose.msra.mxu0 %v455_v7  ;;  %v583_v21 = vpop.eup %582  ;;  %vm258_vm12 = vcmp.lt.f32.partialorder %v257_v24, 0.0004427343 }
  0x5f   :  { %v262_v25 = vmul.f32 0.6931472, %v583_v21  ;;  %v453_v59 = vadd.f32 %v437_v18, %v85_v20  ;;  %v585_v26 = vpop.eup %584  ;;  %v256_v28 = vmul.f32 %v581_v8, %v255_v13 }
  0x60   :  { %v242_v29 = vadd.f32 1.0, %v585_v26  ;;  %v245_v52 = vmul.f32 -0.5, %v585_v26  ;;  %v248_v45 = vand.u32 2147483647, %v585_v26 }
  0x61   :  { %v268_v27 = vsel %vm267_vm10, %v265_v4, %v262_v25 }
  0x62   :  { %478 = vmatpush.xpose.msra.mxu0 %v454_v35  ;;  %v388_v39 = vadd.f32 %v268_v27, %v132_v22  ;;  %588 = vlog2.f32 %v242_v29  ;;  %v246_v43 = vadd.f32 1.0, %v245_v52  ;;  %vm249_vm14 = vcmp.lt.f32.partialorder %v248_v45, 0.0004427343 }
  0x63   :  { %v587_v30 = vpop.eup %586 }
  0x64   :  { %v253_v5 = vmul.f32 0.6931472, %v587_v30  ;;  %v404_v36 = vsel %vm148_vm11, %v925_v19, %v388_v39  ;;  %v247_v51 = vmul.f32 %v585_v26, %v246_v43  ;;  %v130_v19 = vmax.f32 %v949_v49, 0.0 }
  0x65   :  { %v420_v41 = vadd.f32 1e-05, %v404_v36 }
  0x66   :  { %479 = vmatpush.xpose.msra.mxu0 %v453_v59  ;;  %v259_v42 = vsel %vm258_vm12, %v256_v28, %v253_v5 }
  0x67   :  { %v387_v44 = vadd.f32 %v259_v42, %v131_v6  ;;  %v436_v46 = vmul.f32 %v420_v41, %v116_v9 }
  0x68   :  { %v589_v16 = vpop.eup %588 }
  0x69   :  { %v403_v12 = vsel %vm147_vm13, %v937_v40, %v387_v44  ;;  %v452_v48 = vadd.f32 %v436_v46, %v84_v31  ;;  %v244_v32 = vmul.f32 0.6931472, %v589_v16 }
  0x6a   :  { %v419_v50 = vadd.f32 1e-05, %v403_v12 }
  0x6b   :  { %480 = vmatpush.xpose.msra.mxu0 %v452_v48  ;;  %v250_v33 = vsel %vm249_vm14, %v247_v51, %v244_v32 }
  0x6c   :  { %v435_v54 = vmul.f32 %v419_v50, %v115_v47  ;;  %v386_v58 = vadd.f32 %v250_v33, %v130_v19 }
  0x6e   :  { %v451_v55 = vadd.f32 %v435_v54, %v83_v53  ;;  %v402_v40 = vsel %vm146_vm15, %v949_v49, %v386_v58 }
  0x6f   :  { %v418_v61 = vadd.f32 1e-05, %v402_v40 }
  0x70   :  { %481 = vmatpush.xpose.msra.mxu0 %v451_v55 }
  0x71   :  { %v434_v37 = vmul.f32 %v418_v61, %v114_v60 }
  0x73   :  { %v450_v57 = vadd.f32 %v434_v37, %v82_v62 }
  0x75   :  { %482 = vmatpush.xpose.msra.mxu0 %v450_v57 }
  0x78   :  { %483 = vmatmul.f32.vlgmr.msra.gmra.mxu0 %v466_v63 }
  0xf5   :  { %v484_v1 = vpop.f32.mrf.mxu0 }
  0xf6   :  { %v497_v38 = vadd.f32 %v525_v0, %v484_v1 }
  0xf8   :  { %498 = vst [vmem:[#allocation10] sm:$0xff] %v497_v38 }
  0xf9   :  { %509 = dma.vmem_to_hbm [thread:$0]  %s505_s14, 128, %s507_s17, [#allocation4]  }
  0xfa   :  { %716 = dma.done.wait [#allocation4], 128  }
  0xfb   :  { %717 = vsyncadd [#allocation4], 4294967168 }
  0xfc   :  { %514 = vsyncpa [#allocation3], 1 }
  0xfd   :  { %515 = vsyncpa [#allocation6], 1 }
  0xfe   :  { %516 = vsyncpa [#allocation9], 1 }
  0xff   :  { %517 = vsyncpa [#allocation4], 1 }

</bundles_post_ra>
